<compile_context>
chip_gen: v7x
topology: tpu7x:2x2x1
jax: 0.10.0
libtpu: 0.0.40
codegen_flags: <defaults>
</compile_context>

<pallas_src>
import functools

import jax
import jax.numpy as jnp
from jax import lax
from jax.experimental import pallas as pl
from jax.experimental.pallas import tpu as pltpu

LANE = 128


def _round_up(n, m=LANE):
    return ((n + m - 1) // m) * m


def _pad2d(w, rows, cols):
    return jnp.pad(w, ((0, rows - w.shape[0]), (0, cols - w.shape[1])))


# ----------------------------------------------------------------------------
# Fused encoder + hyper-decoder kernel (whole batch in one program)
# ----------------------------------------------------------------------------
def seq2seq_kernel(x_ref, s_ref, w_in_ref, wqkv_ref, w_out_ref,
                   w_gb_ref, b_gb_ref, w_dec_ref, b_dec_ref,
                   rec_ref, c_ref, *, B, T, Hp):
    f32 = jnp.float32
    bf16 = jnp.bfloat16

    # ---------------- content encoder (self-attention) ----------------
    # Stacked (B*T, D) rows: batch-independent weights -> one wide MXU matmul each.
    h = jnp.tanh(jnp.dot(x_ref[...], w_in_ref[...],
                         preferred_element_type=f32))                       # (B*T, Hp) f32

    # fused QKV projection (single MXU push); 1/sqrt(H) already folded into Wq
    qkv = jnp.dot(h.astype(bf16), wqkv_ref[...],
                  preferred_element_type=f32)                               # (B*T, 3*Hp)
    q = qkv[:, :Hp].astype(bf16).reshape(B, T, Hp)
    k = qkv[:, Hp:2 * Hp].astype(bf16).reshape(B, T, Hp)
    v = qkv[:, 2 * Hp:].astype(bf16).reshape(B, T, Hp)

    # batched q @ k^T: contract last dims, batch over B -> no transpose of k
    scores = lax.dot_general(q, k,
                             dimension_numbers=(((2,), (2,)), ((0,), (0,))),
                             preferred_element_type=f32)                    # (B, T, T) f32

    # numerically-stable softmax in f32; approx reciprocal runs on the EUP slot
    m = scores.max(axis=-1, keepdims=True)
    p = jnp.exp(scores - m)
    p = p * pl.reciprocal(p.sum(axis=-1, keepdims=True), approx=True)

    attn = lax.dot_general(p.astype(bf16), v,
                           dimension_numbers=(((2,), (1,)), ((0,), (0,))),
                           preferred_element_type=f32)                      # (B, T, Hp)

    c = jnp.dot((h + attn.reshape(B * T, Hp)).astype(bf16), w_out_ref[...],
                preferred_element_type=f32)                                 # (B*T, Hp) f32
    c_ref[...] = c.reshape(B, T, Hp)

    # ---------------- hyper-decoder (style -> FiLM -> projection) ----------------
    # one (B, Sp) x (Sp, 2*Hp) matmul produces gamma|beta for the whole batch
    gb = jnp.dot(s_ref[...], w_gb_ref[...],
                 preferred_element_type=f32) + b_gb_ref[...]                # (B, 2*Hp) f32
    gamma = gb[:, :Hp]
    beta = gb[:, Hp:]
    film_scale = 1.0 + gamma                                                # (B, Hp)

    mod = jnp.tanh(c.reshape(B, T, Hp) * film_scale[:, None, :]
                   + beta[:, None, :])                                      # (B, T, Hp) f32

    rec = lax.dot_general(mod.astype(bf16), w_dec_ref[...],
                          dimension_numbers=(((2,), (0,)), ((), ())),
                          preferred_element_type=f32) + b_dec_ref[...]      # (B, T, Op)
    rec_ref[...] = rec


# ----------------------------------------------------------------------------
# One-time weight prep (call ONCE at init; never in the per-step path)
# ----------------------------------------------------------------------------
def prepare_params(enc_params, dec_params):
    """Pad lane dims to 128, fuse QKV / gamma|beta, fold 1/sqrt(H) into Wq,
    cast MXU operands to bf16.  Biases stay f32 (added after f32 accumulation).

    NOTE: zero padding keeps the math exact on the un-padded slice because
    tanh(0)=0 and every bias is zero-padded; a nonlinearity with f(0)!=0 or a
    nonzero-padded bias would leak padded Hp lanes into the attention sums.
    """
    f32, bf16 = jnp.float32, jnp.bfloat16
    D_in, H = enc_params["w_in"].shape
    D_style = dec_params["wg"].shape[0]
    D_out = dec_params["w_dec"].shape[1]
    Hp, Op = _round_up(H), _round_up(D_out)

    scale = 1.0 / (float(H) ** 0.5)                   # fold softmax 1/sqrt(H) into Wq

    w_in = _pad2d(enc_params["w_in"].astype(f32), D_in, Hp)               # (D_in, Hp)
    wqkv = jnp.concatenate(
        [_pad2d(enc_params["wq"].astype(f32) * scale, Hp, Hp),
         _pad2d(enc_params["wk"].astype(f32), Hp, Hp),
         _pad2d(enc_params["wv"].astype(f32), Hp, Hp)], axis=1)           # (Hp, 3*Hp)
    w_out = _pad2d(enc_params["w_out"].astype(f32), Hp, Hp)               # (Hp, Hp)
    w_gb = jnp.concatenate(
        [_pad2d(dec_params["wg"].astype(f32), D_style, Hp),
         _pad2d(dec_params["wb"].astype(f32), D_style, Hp)], axis=1)      # (Ds, 2*Hp)
    b_gb = jnp.concatenate(
        [_pad2d(dec_params["bg"].astype(f32), 1, Hp),
         _pad2d(dec_params["bb"].astype(f32), 1, Hp)], axis=1)            # (1, 2*Hp)
    w_dec = _pad2d(dec_params["w_dec"].astype(f32), Hp, Op)               # (Hp, Op)
    b_dec = _pad2d(dec_params["b_dec"].astype(f32), 1, Op)                # (1, Op)

    weights = dict(
        w_in=w_in.astype(bf16), wqkv=wqkv.astype(bf16), w_out=w_out.astype(bf16),
        w_gb=w_gb.astype(bf16), b_gb=b_gb,
        w_dec=w_dec.astype(bf16), b_dec=b_dec)
    dims = (D_in, H, D_style, D_out, Hp, Op)
    return weights, dims


# ----------------------------------------------------------------------------
# Forward wrapper (jit: x cast/reshape and output slices fuse around the kernel)
# ----------------------------------------------------------------------------
@functools.partial(jax.jit, static_argnames=("dims",))
def seq2seq_forward(x_src, style_tgt, weights, dims):
    """Matches Seq2Seq.forward: returns (rec_src2tgt, c_src)."""
    D_in, H, D_style, D_out, Hp, Op = dims
    B, T, _ = x_src.shape
    bf16 = jnp.bfloat16

    x2d = x_src.reshape(B * T, D_in).astype(bf16)     # stacked rows -> wide MXU M dim
    s = style_tgt.astype(bf16)

    vmem = pl.BlockSpec(memory_space=pltpu.MemorySpace.VMEM)

    rec_p, c_p = pl.pallas_call(
        functools.partial(seq2seq_kernel, B=B, T=T, Hp=Hp),
        out_shape=(jax.ShapeDtypeStruct((B, T, Op), jnp.float32),
                   jax.ShapeDtypeStruct((B, T, Hp), jnp.float32)),
        in_specs=[vmem] * 9,
        out_specs=(vmem, vmem),
    )(x2d, s, weights["w_in"], weights["wqkv"], weights["w_out"],
      weights["w_gb"], weights["b_gb"], weights["w_dec"], weights["b_dec"])

    # lane-dense (128-wide) stores inside the kernel; slice back to the logical
    # widths here so it fuses with any downstream consumer under jit.
    return rec_p[..., :D_out], c_p[..., :H]


# ----------------------------------------------------------------------------
# Pure-JAX reference (correctness check)
# ----------------------------------------------------------------------------
def seq2seq_reference(x_src, style_tgt, ep, dp):
    h = jnp.tanh(jnp.einsum("btd,dh->bth", x_src, ep["w_in"]))
    q = jnp.einsum("bth,hk->btk", h, ep["wq"])
    k = jnp.einsum("bth,hk->btk", h, ep["wk"])
    v = jnp.einsum("bth,hk->btk", h, ep["wv"])
    scores = jnp.einsum("btk,bsk->bts", q, k) / jnp.sqrt(jnp.float32(q.shape[-1]))
    p = jax.nn.softmax(scores, axis=-1)
    attn = jnp.einsum("bts,bsk->btk", p, v)
    c = jnp.einsum("bth,hk->btk", h + attn, ep["w_out"])
    gamma = style_tgt @ dp["wg"] + dp["bg"]
    beta = style_tgt @ dp["wb"] + dp["bb"]
    mod = jnp.tanh(c * (1.0 + gamma[:, None, :]) + beta[:, None, :])
    rec = jnp.einsum("bth,hd->btd", mod, dp["w_dec"]) + dp["b_dec"]
    return rec, c


# ----------------------------------------------------------------------------
# Main
# ----------------------------------------------------------------------------
if __name__ == "__main__":
    B, T, D_IN, H, D_STYLE, D_OUT = 2, 16, 16, 32, 8, 16

    key = jax.random.PRNGKey(0)
    keys = jax.random.split(key, 12)

    def init(k, shape, scale=0.1):
        return (scale * jax.random.normal(k, shape)).astype(jnp.float32)

    enc_params = {
        "w_in": init(keys[0], (D_IN, H)),
        "wq": init(keys[1], (H, H)),
        "wk": init(keys[2], (H, H)),
        "wv": init(keys[3], (H, H)),
        "w_out": init(keys[4], (H, H)),
    }
    dec_params = {
        "wg": init(keys[5], (D_STYLE, H)),
        "bg": init(keys[6], (1, H)),
        "wb": init(keys[7], (D_STYLE, H)),
        "bb": init(keys[8], (1, H)),
        "w_dec": init(keys[9], (H, D_OUT)),
        "b_dec": init(keys[10], (1, D_OUT)),
    }

    x_src = jax.random.normal(keys[11], (B, T, D_IN), dtype=jnp.float32)
    style_tgt = jax.random.normal(jax.random.PRNGKey(1), (B, D_STYLE), dtype=jnp.float32)

    # weight prep hoisted out of the per-call path: computed exactly once here
    weights, dims = prepare_params(enc_params, dec_params)
    weights = jax.block_until_ready(weights)

    rec, c_src = seq2seq_forward(x_src, style_tgt, weights, dims)
    jax.block_until_ready((rec, c_src))

    rec_ref, c_ref = seq2seq_reference(x_src, style_tgt, enc_params, dec_params)
    assert rec.shape == (B, T, D_OUT) and c_src.shape == (B, T, H)
    # tolerance accounts for bf16 MXU operands + approx (EUP) softmax reciprocal
    assert jnp.allclose(rec, rec_ref, atol=2e-2, rtol=2e-2)
    assert jnp.allclose(c_src, c_ref, atol=2e-2, rtol=2e-2)

    print("KERNEL_OK")
</pallas_src>

<mosaic_0001>
module attributes {stable_mosaic.version = 11 : i64} {
  func.func @seq2seq_kernel(%arg0: memref<32x16xbf16, #tpu.memory_space<vmem>>, %arg1: memref<2x8xbf16, #tpu.memory_space<vmem>>, %arg2: memref<16x128xbf16, #tpu.memory_space<vmem>>, %arg3: memref<128x384xbf16, #tpu.memory_space<vmem>>, %arg4: memref<128x128xbf16, #tpu.memory_space<vmem>>, %arg5: memref<8x256xbf16, #tpu.memory_space<vmem>>, %arg6: memref<1x256xf32, #tpu.memory_space<vmem>>, %arg7: memref<128x128xbf16, #tpu.memory_space<vmem>>, %arg8: memref<1x128xf32, #tpu.memory_space<vmem>>, %arg9: memref<2x16x128xf32, #tpu.memory_space<vmem>>, %arg10: memref<2x16x128xf32, #tpu.memory_space<vmem>>) attributes {dimension_semantics = [], scalar_prefetch = 0 : i64, scratch_operands = 0 : i64, tpu.core_type = #tpu.core_type<tc>} {
    %c0 = arith.constant 0 : index
    %c0_0 = arith.constant 0 : index
    %0 = vector.load %arg0[%c0, %c0_0] : memref<32x16xbf16, #tpu.memory_space<vmem>>, vector<32x16xbf16>
    %c0_1 = arith.constant 0 : index
    %c0_2 = arith.constant 0 : index
    %1 = vector.load %arg2[%c0_1, %c0_2] : memref<16x128xbf16, #tpu.memory_space<vmem>>, vector<16x128xbf16>
    %cst = arith.constant dense<0.000000e+00> : vector<32x128xf32>
    %2 = tpu.matmul %0, %1, %cst {dimension_numbers = #tpu.dot_dimension_numbers<[1], [0], [0], [1], [0, 0, 1, 1], [], []>} : vector<32x16xbf16>, vector<16x128xbf16>, vector<32x128xf32> -> vector<32x128xf32>
    %3 = math.tanh %2 : vector<32x128xf32>
    %4 = arith.truncf %3 : vector<32x128xf32> to vector<32x128xbf16>
    %c0_3 = arith.constant 0 : index
    %c0_4 = arith.constant 0 : index
    %5 = vector.load %arg3[%c0_3, %c0_4] : memref<128x384xbf16, #tpu.memory_space<vmem>>, vector<128x384xbf16>
    %cst_5 = arith.constant dense<0.000000e+00> : vector<32x384xf32>
    %6 = tpu.matmul %4, %5, %cst_5 {dimension_numbers = #tpu.dot_dimension_numbers<[1], [0], [0], [1], [0, 0, 1, 1], [], []>} : vector<32x128xbf16>, vector<128x384xbf16>, vector<32x384xf32> -> vector<32x384xf32>
    %7 = vector.extract_strided_slice %6 {offsets = [0, 0], sizes = [32, 128], strides = [1, 1]} : vector<32x384xf32> to vector<32x128xf32>
    %8 = arith.truncf %7 : vector<32x128xf32> to vector<32x128xbf16>
    %9 = vector.shape_cast %8 : vector<32x128xbf16> to vector<2x16x128xbf16>
    %10 = vector.extract_strided_slice %6 {offsets = [0, 128], sizes = [32, 128], strides = [1, 1]} : vector<32x384xf32> to vector<32x128xf32>
    %11 = arith.truncf %10 : vector<32x128xf32> to vector<32x128xbf16>
    %12 = vector.shape_cast %11 : vector<32x128xbf16> to vector<2x16x128xbf16>
    %13 = vector.extract_strided_slice %6 {offsets = [0, 256], sizes = [32, 128], strides = [1, 1]} : vector<32x384xf32> to vector<32x128xf32>
    %14 = arith.truncf %13 : vector<32x128xf32> to vector<32x128xbf16>
    %15 = vector.shape_cast %14 : vector<32x128xbf16> to vector<2x16x128xbf16>
    %cst_6 = arith.constant dense<0.000000e+00> : vector<2x16x16xf32>
    %16 = tpu.matmul %9, %12, %cst_6 {dimension_numbers = #tpu.dot_dimension_numbers<[2], [2], [1], [1], [0, 0, 0, 1, 1, 1], [0], [0]>} : vector<2x16x128xbf16>, vector<2x16x128xbf16>, vector<2x16x16xf32> -> vector<2x16x16xf32>
    %cst_7 = arith.constant dense<0xFF800000> : vector<2x16xf32>
    %17 = vector.multi_reduction <maximumf>, %16, %cst_7 [2] : vector<2x16x16xf32> to vector<2x16xf32>
    %18 = vector.shape_cast %17 : vector<2x16xf32> to vector<2x16x1xf32>
    %19 = vector.broadcast %18 : vector<2x16x1xf32> to vector<2x16x16xf32>
    %20 = arith.subf %16, %19 : vector<2x16x16xf32>
    %21 = math.exp %20 : vector<2x16x16xf32>
    %cst_8 = arith.constant dense<0.000000e+00> : vector<2x16xf32>
    %22 = vector.multi_reduction <add>, %21, %cst_8 [2] : vector<2x16x16xf32> to vector<2x16xf32>
    %23 = vector.shape_cast %22 : vector<2x16xf32> to vector<2x16x1xf32>
    %24 = tpu.reciprocal %23 {approx = true} : vector<2x16x1xf32> -> vector<2x16x1xf32>
    %25 = vector.broadcast %24 : vector<2x16x1xf32> to vector<2x16x16xf32>
    %26 = arith.mulf %21, %25 : vector<2x16x16xf32>
    %27 = arith.truncf %26 : vector<2x16x16xf32> to vector<2x16x16xbf16>
    %cst_9 = arith.constant dense<0.000000e+00> : vector<2x16x128xf32>
    %28 = tpu.matmul %27, %15, %cst_9 {dimension_numbers = #tpu.dot_dimension_numbers<[2], [1], [1], [2], [0, 0, 0, 1, 1, 2], [0], [0]>} : vector<2x16x16xbf16>, vector<2x16x128xbf16>, vector<2x16x128xf32> -> vector<2x16x128xf32>
    %29 = vector.shape_cast %28 : vector<2x16x128xf32> to vector<32x128xf32>
    %30 = arith.addf %3, %29 : vector<32x128xf32>
    %31 = arith.truncf %30 : vector<32x128xf32> to vector<32x128xbf16>
    %c0_10 = arith.constant 0 : index
    %c0_11 = arith.constant 0 : index
    %32 = vector.load %arg4[%c0_10, %c0_11] : memref<128x128xbf16, #tpu.memory_space<vmem>>, vector<128x128xbf16>
    %cst_12 = arith.constant dense<0.000000e+00> : vector<32x128xf32>
    %33 = tpu.matmul %31, %32, %cst_12 {dimension_numbers = #tpu.dot_dimension_numbers<[1], [0], [0], [1], [0, 0, 1, 1], [], []>} : vector<32x128xbf16>, vector<128x128xbf16>, vector<32x128xf32> -> vector<32x128xf32>
    %34 = vector.shape_cast %33 : vector<32x128xf32> to vector<2x16x128xf32>
    %c0_13 = arith.constant 0 : index
    %c0_14 = arith.constant 0 : index
    %c0_15 = arith.constant 0 : index
    %35 = vector.load %arg10[%c0_13, %c0_14, %c0_15] : memref<2x16x128xf32, #tpu.memory_space<vmem>>, vector<2x16x128xf32>
    tpu.vector_store %arg10[%c0_13, %c0_14, %c0_15], %34 {strides = array<i32>} : memref<2x16x128xf32, #tpu.memory_space<vmem>>, vector<2x16x128xf32>,
    %c0_16 = arith.constant 0 : index
    %c0_17 = arith.constant 0 : index
    %36 = vector.load %arg1[%c0_16, %c0_17] : memref<2x8xbf16, #tpu.memory_space<vmem>>, vector<2x8xbf16>
    %c0_18 = arith.constant 0 : index
    %c0_19 = arith.constant 0 : index
    %37 = vector.load %arg5[%c0_18, %c0_19] : memref<8x256xbf16, #tpu.memory_space<vmem>>, vector<8x256xbf16>
    %cst_20 = arith.constant dense<0.000000e+00> : vector<2x256xf32>
    %38 = tpu.matmul %36, %37, %cst_20 {dimension_numbers = #tpu.dot_dimension_numbers<[1], [0], [0], [1], [0, 0, 1, 1], [], []>} : vector<2x8xbf16>, vector<8x256xbf16>, vector<2x256xf32> -> vector<2x256xf32>
    %c0_21 = arith.constant 0 : index
    %c0_22 = arith.constant 0 : index
    %39 = vector.load %arg6[%c0_21, %c0_22] : memref<1x256xf32, #tpu.memory_space<vmem>>, vector<1x256xf32>
    %40 = vector.broadcast %39 : vector<1x256xf32> to vector<2x256xf32>
    %41 = arith.addf %38, %40 : vector<2x256xf32>
    %42 = vector.extract_strided_slice %41 {offsets = [0, 0], sizes = [2, 128], strides = [1, 1]} : vector<2x256xf32> to vector<2x128xf32>
    %43 = vector.extract_strided_slice %41 {offsets = [0, 128], sizes = [2, 128], strides = [1, 1]} : vector<2x256xf32> to vector<2x128xf32>
    %cst_23 = arith.constant 1.000000e+00 : f32
    %44 = vector.broadcast %cst_23 : f32 to vector<2x128xf32>
    %45 = arith.addf %44, %42 : vector<2x128xf32>
    %46 = vector.shape_cast %33 : vector<32x128xf32> to vector<2x16x128xf32>
    %47 = vector.shape_cast %45 : vector<2x128xf32> to vector<2x1x128xf32>
    %48 = vector.broadcast %47 : vector<2x1x128xf32> to vector<2x16x128xf32>
    %49 = arith.mulf %46, %48 : vector<2x16x128xf32>
    %50 = vector.shape_cast %43 : vector<2x128xf32> to vector<2x1x128xf32>
    %51 = vector.broadcast %50 : vector<2x1x128xf32> to vector<2x16x128xf32>
    %52 = arith.addf %49, %51 : vector<2x16x128xf32>
    %53 = math.tanh %52 : vector<2x16x128xf32>
    %54 = arith.truncf %53 : vector<2x16x128xf32> to vector<2x16x128xbf16>
    %c0_24 = arith.constant 0 : index
    %c0_25 = arith.constant 0 : index
    %55 = vector.load %arg7[%c0_24, %c0_25] : memref<128x128xbf16, #tpu.memory_space<vmem>>, vector<128x128xbf16>
    %cst_26 = arith.constant dense<0.000000e+00> : vector<2x16x128xf32>
    %56 = tpu.matmul %54, %55, %cst_26 {dimension_numbers = #tpu.dot_dimension_numbers<[2], [0], [0, 1], [1], [0, 0, 0, 1, 1, 1], [], []>} : vector<2x16x128xbf16>, vector<128x128xbf16>, vector<2x16x128xf32> -> vector<2x16x128xf32>
    %c0_27 = arith.constant 0 : index
    %c0_28 = arith.constant 0 : index
    %57 = vector.load %arg8[%c0_27, %c0_28] : memref<1x128xf32, #tpu.memory_space<vmem>>, vector<1x128xf32>
    %58 = vector.shape_cast %57 : vector<1x128xf32> to vector<1x1x128xf32>
    %59 = vector.broadcast %58 : vector<1x1x128xf32> to vector<2x16x128xf32>
    %60 = arith.addf %56, %59 : vector<2x16x128xf32>
    %c0_29 = arith.constant 0 : index
    %c0_30 = arith.constant 0 : index
    %c0_31 = arith.constant 0 : index
    %61 = vector.load %arg9[%c0_29, %c0_30, %c0_31] : memref<2x16x128xf32, #tpu.memory_space<vmem>>, vector<2x16x128xf32>
    tpu.vector_store %arg9[%c0_29, %c0_30, %c0_31], %60 {strides = array<i32>} : memref<2x16x128xf32, #tpu.memory_space<vmem>>, vector<2x16x128xf32>,
    return
  }
}

</mosaic_0001>

<bundles_post_ra>
// kernel: seq2seq_forward.1
= control target key start
LH: loop header
LB: loop body
LE: loop exit
PB: predicated region body
PF: predicated region fallthrough
CT: control target
= control target key end

     0   :  { %16 = vsyncpa [#allocation3], 0  ;;  %s1693_s0 = inlined_call_operand.vmem [shape: bf16[32,16], index: 0, kind: input, shape index: {}]   ;;  %s1694_s1 = inlined_call_operand.vmem [shape: bf16[2,8], index: 1, kind: input, shape index: {}]   ;;  %s1695_s2 = inlined_call_operand.vmem [shape: bf16[16,128], index: 2, kind: input, shape index: {}]   ;;  %s1696_s3 = inlined_call_operand.hbm [shape: bf16[128,384], index: 3, kind: input, shape index: {}]   ;;  %s1697_s4 = inlined_call_operand.vmem [shape: bf16[128,128], index: 4, kind: input, shape index: {}]   ;;  %s1698_s5 = inlined_call_operand.vmem [shape: bf16[8,256], index: 5, kind: input, shape index: {}]   ;;  %s1699_s6 = inlined_call_operand.vmem [shape: f32[1,256], index: 6, kind: input, shape index: {}]   ;;  %s1700_s7 = inlined_call_operand.hbm [shape: bf16[128,128], index: 7, kind: input, shape index: {}]   ;;  %s1701_s8 = inlined_call_operand.hbm [shape: f32[1,128], index: 8, kind: input, shape index: {}]   ;;  %s1702_s9 = inlined_call_operand.hbm [shape: f32[2,16,128], index: 9, kind: output, shape index: {0}]   ;;  %s1703_s10 = inlined_call_operand.hbm [shape: f32[2,16,128], index: 10, kind: output, shape index: {1}]  }
   0x1   :  { %17 = vsyncpa [#allocation6], 0 }
   0x2   :  { %18 = vsyncpa [#allocation4], 0 }
   0x3   :  { %19 = vsyncpa [#allocation10], 0  ;;  %s1478_s13 = smov [#allocation5]   ;;  %s1360_s17 = scalar_lea.hbm %s1700_s7, 1024 }
   0x4   :  { %s49_s14 = sshll.u32 %s1478_s13, 4  ;;  %p1361_p0 = scmp.ne.s32.totalorder %s1700_s7, %s1360_s17  ;;  %s50_s14 = int_to_ptr.vmem [resolvable:$true] %s49_s14 }
   0x5   :  { %p1364_p1 = scmp.lt.u32.totalorder %s1360_s17, %s1700_s7 }
   0x7   :  { %p1366_p2 = pnand %p1364_p1, %p1361_p0 }
   0x9   :  { %1369 = shalt.err (!%p1366_p2)
}
   0xa   :  { %s1370_s22 = scalar_lea.vmem %s50_s14, 1024  ;;  %p1375_p4 = scmp.lt.s32.totalorder %s50_s14, %s50_s14 }
   0xb   :  { %p1371_p3 = scmp.ne.s32.totalorder %s50_s14, %s1370_s22  ;;  %p1376_p5 = scmp.lt.s32.totalorder %s1370_s22, %s1370_s22 }
   0xd   :  { %p1377_p6 = por %p1376_p5, %p1375_p4 }
   0xf   :  { %p1378_p7 = pnand %p1377_p6, %p1371_p3 }
  0x11   :  { %1381 = shalt.err (!%p1378_p7)
}
  0x12   :  { %s1479_s23 = smov 64   ;;  %s1480_s24 = smov 4  }
  0x13   :  { %55 = dma.hbm_to_vmem [thread:$0]  %s1700_s7, 1024, %s50_s14, [#allocation6], %s1479_s23, %s1479_s23, %s1480_s24  }
  0x14   :  { %s1481_s27 = smov [#allocation2]   ;;  %s1382_s11 = scalar_lea.hbm %s1696_s3, 3072 }
  0x15   :  { %s31_s28 = sshll.u32 %s1481_s27, 4  ;;  %p1383_p8 = scmp.ne.s32.totalorder %s1696_s3, %s1382_s11  ;;  %s32_s28 = int_to_ptr.vmem [resolvable:$true] %s31_s28 }
  0x16   :  { %p1386_p9 = scmp.lt.u32.totalorder %s1382_s11, %s1696_s3 }
  0x18   :  { %p1388_p10 = pnand %p1386_p9, %p1383_p8 }
  0x1a   :  { %1391 = shalt.err (!%p1388_p10)
}
  0x1b   :  { %s1392_s17 = scalar_lea.vmem %s32_s28, 3072  ;;  %p1397_p12 = scmp.lt.s32.totalorder %s32_s28, %s32_s28 }
  0x1c   :  { %p1393_p11 = scmp.ne.s32.totalorder %s32_s28, %s1392_s17  ;;  %p1398_p13 = scmp.lt.s32.totalorder %s1392_s17, %s1392_s17 }
  0x1e   :  { %p1399_p0 = por %p1398_p13, %p1397_p12 }
  0x20   :  { %p1400_p1 = pnand %p1399_p0, %p1393_p11 }
  0x22   :  { %1403 = shalt.err (!%p1400_p1)
}
  0x23   :  { %s1482_s7 = smov 192   ;;  %s1483_s14 = smov 12  }
  0x24   :  { %37 = dma.hbm_to_vmem [thread:$0]  %s1696_s3, 3072, %s32_s28, [#allocation3], %s1482_s7, %s1482_s7, %s1483_s14  }
  0x25   :  { %s1484_s20 = smov [#allocation7]   ;;  %s1404_s24 = scalar_lea.hbm %s1701_s8, 16 }
  0x26   :  { %s62_s21 = sshll.u32 %s1484_s20, 4  ;;  %p1405_p2 = scmp.ne.s32.totalorder %s1701_s8, %s1404_s24  ;;  %s63_s21 = int_to_ptr.vmem [resolvable:$true] %s62_s21 }
  0x27   :  { %p1408_p3 = scmp.lt.u32.totalorder %s1404_s24, %s1701_s8 }
  0x29   :  { %p1410_p4 = pnand %p1408_p3, %p1405_p2 }
  0x2b   :  { %1413 = shalt.err (!%p1410_p4)
}
  0x2c   :  { %s1414_s30 = scalar_lea.vmem %s63_s21, 16  ;;  %s1418_s3 = scalar_lea.vmem %s63_s21, 32 }
  0x2d   :  { %p1415_p5 = scmp.ne.s32.totalorder %s63_s21, %s1414_s30  ;;  %p1419_p6 = scmp.lt.s32.totalorder %s63_s21, %s63_s21 }
  0x2e   :  { %p1420_p7 = scmp.lt.s32.totalorder %s1418_s3, %s1414_s30 }
  0x30   :  { %p1421_p8 = por %p1420_p7, %p1419_p6 }
  0x32   :  { %p1422_p9 = pnand %p1421_p8, %p1415_p5 }
  0x34   :  { %1425 = shalt.err (!%p1422_p9)
}
  0x35   :  { %65 = dma.hbm_to_vmem [thread:$0]  %s1701_s8, 16, %s63_s21, [#allocation6]  }
  0x36   :  { %1470 = dma.done.wait [#allocation3], 3072  }
  0x37   :  { %1471 = vsyncadd [#allocation3], 4294964224 }
  0x38   :  { %1472 = dma.done.wait [#allocation6], 1040  }
  0x39   :  { %1473 = vsyncadd [#allocation6], 4294966256  ;;  %v1275_v0 = vld [vmem:[%s1695_s2] sm:$0xff]   ;;  %vm98_vm0 = vcmask 130048   ;;  %v1277_v2 = vld [vmem:[%s1693_s0 + $0x8] sm:$0xff]   ;;  %v1485_v26 = vmov 0  }
  0x3a   :  { %v1276_v1 = vld [vmem:[%s1693_s0] sm:$0xff]   ;;  %1170 = vmatprep.subr.bf16.mxu0 %v1275_v0  ;;  %v1281_v5 = vld [vmem:[#allocation2 + $0x8] ss:$12 sps:$4 sm:$0xff]   ;;  %v1288_v11 = vld [vmem:[#allocation2 + $0x30] ss:$12 sps:$4 sm:$0xff]   ;;  %352 = vmatprep.mubr.bf16.mxu1 %v1485_v26  ;;  %v1486_v38 = vmov 0.0  }
  0x3b   :  { %1171 = vmatpush3.bf16.msra.mxu0 %v1275_v0  ;;  %1172 = vmatprep.mubr.msk.bf16.mxu0 %vm98_vm0, %v1276_v1  ;;  %v1278_v3 = vld [vmem:[#allocation2 + $0x4] ss:$12 sps:$4 sm:$0xff]   ;;  %v1280_v4 = vld [vmem:[#allocation2] ss:$12 sps:$4 sm:$0xff]   ;;  %v1282_v6 = vld [vmem:[#allocation2 + $0x1c] ss:$12 sps:$4 sm:$0xff]  }
  0x3c   :  { %320 = vmatprep.subr.bf16.mxu1 %v1278_v3  ;;  %v1284_v7 = vld [vmem:[#allocation2 + $0x18] ss:$12 sps:$4 sm:$0xff]   ;;  %1176 = vmatprep.subr.bf16.mxu0 %v1281_v5  ;;  %v1285_v8 = vld [vmem:[#allocation2 + $0x20] ss:$12 sps:$4 sm:$0xff]   ;;  %v1292_v13 = vld [vmem:[#allocation2 + $0x48] ss:$12 sps:$4 sm:$0xff]  }
  0x3d   :  { %321 = vmatpush1.bf16.msra.mxu1 %v1280_v4  ;;  %v1286_v9 = vld [vmem:[#allocation2 + $0x34] ss:$12 sps:$4 sm:$0xff]   ;;  %v1289_v10 = vld [vmem:[#allocation2 + $0x38] ss:$12 sps:$4 sm:$0xff]   ;;  %v1293_v14 = vld [vmem:[#allocation2 + $0x50] ss:$12 sps:$4 sm:$0xff]  }
  0x3e   :  { %1173 = vmatmul.mubr.msk.bf16.vlgmr.msra.gmra.mrb[0].mxu0 %vm98_vm0, %v1277_v2  ;;  %322 = vmatprep.subr.bf16.mxu1 %v1282_v6  ;;  %v1290_v12 = vld [vmem:[#allocation2 + $0x4c] ss:$12 sps:$4 sm:$0xff]   ;;  %v1294_v15 = vld [vmem:[#allocation2 + $0x64] ss:$12 sps:$4 sm:$0xff]   ;;  %v1297_v17 = vld [vmem:[#allocation2 + $0x68] ss:$12 sps:$4 sm:$0xff]  }
  0x3f   :  { %1177 = vmatpush3.bf16.msra.mxu0 %v1281_v5  ;;  %v1296_v16 = vld [vmem:[#allocation2 + $0x60] ss:$12 sps:$4 sm:$0xff]   ;;  %v1298_v18 = vld [vmem:[#allocation2 + $0x7c] ss:$12 sps:$4 sm:$0xff]   ;;  %v1300_v19 = vld [vmem:[#allocation2 + $0x78] ss:$12 sps:$4 sm:$0xff]  }
  0x40   :  { %1178 = vmatprep.subr.bf16.mxu0 %v1285_v8  ;;  %v1301_v20 = vld [vmem:[#allocation2 + $0x80] ss:$12 sps:$4 sm:$0xff]   ;;  %v1305_v22 = vld [vmem:[#allocation2 + $0x98] ss:$12 sps:$4 sm:$0xff]   ;;  %v1304_v23 = vld [vmem:[#allocation2 + $0x90] ss:$12 sps:$4 sm:$0xff]  }
  0x41   :  { %323 = vmatpush1.bf16.msra.mxu1 %v1284_v7  ;;  %v1302_v21 = vld [vmem:[#allocation2 + $0x94] ss:$12 sps:$4 sm:$0xff]   ;;  %v1306_v24 = vld [vmem:[#allocation2 + $0xac] ss:$12 sps:$4 sm:$0xff]   ;;  %v1309_v25 = vld [vmem:[#allocation2 + $0xb0] ss:$12 sps:$4 sm:$0xff]  }
  0x42   :  { %324 = vmatprep.subr.bf16.mxu1 %v1286_v9  ;;  %v1308_v27 = vld [vmem:[#allocation2 + $0xa8] ss:$12 sps:$4 sm:$0xff]   ;;  %vm1487_vm1 = vmmov 0   ;;  %vm790_vm2 = vcmask 1043456   ;;  %vm786_vm3 = vcmask 64512  }
  0x43   :  { %1179 = vmatpush3.bf16.msra.mxu0 %v1285_v8 }
  0x44   :  { %1180 = vmatprep.subr.bf16.mxu0 %v1289_v10 }
  0x45   :  { %325 = vmatpush1.bf16.msra.mxu1 %v1288_v11 }
  0x46   :  { %326 = vmatprep.subr.bf16.mxu1 %v1290_v12 }
  0x47   :  { %1181 = vmatpush3.bf16.msra.mxu0 %v1289_v10 }
  0x48   :  { %1182 = vmatprep.subr.bf16.mxu0 %v1293_v14 }
  0x49   :  { %327 = vmatpush1.bf16.msra.mxu1 %v1292_v13 }
  0x4a   :  { %328 = vmatprep.subr.bf16.mxu1 %v1294_v15 }
  0x4b   :  { %1183 = vmatpush3.bf16.msra.mxu0 %v1293_v14 }
  0x4c   :  { %1184 = vmatprep.subr.bf16.mxu0 %v1297_v17 }
  0x4d   :  { %329 = vmatpush1.bf16.msra.mxu1 %v1296_v16 }
  0x4e   :  { %330 = vmatprep.subr.bf16.mxu1 %v1298_v18 }
  0x4f   :  { %1185 = vmatpush3.bf16.msra.mxu0 %v1297_v17 }
  0x50   :  { %1186 = vmatprep.subr.bf16.mxu0 %v1301_v20 }
  0x51   :  { %331 = vmatpush1.bf16.msra.mxu1 %v1300_v19 }
  0x52   :  { %332 = vmatprep.subr.bf16.mxu1 %v1302_v21 }
  0x53   :  { %1187 = vmatpush3.bf16.msra.mxu0 %v1301_v20 }
  0x54   :  { %1188 = vmatprep.subr.bf16.mxu0 %v1305_v22 }
  0x55   :  { %333 = vmatpush1.bf16.msra.mxu1 %v1304_v23 }
  0x56   :  { %334 = vmatprep.subr.bf16.mxu1 %v1306_v24 }
  0x57   :  { %1189 = vmatpush3.bf16.msra.mxu0 %v1305_v22 }
  0x58   :  { %1190 = vmatprep.subr.bf16.mxu0 %v1309_v25 }
  0x59   :  { %335 = vmatpush1.bf16.msra.mxu1 %v1308_v27  ;;  %v768_v27 = vld [vmem:[%s1698_s5] sm:$0xff] }
  0x5a   :  { %1214 = vmatprep.subr.bf16.mxu1 %v1486_v38 }
  0x5b   :  { %1191 = vmatpush3.bf16.msra.mxu0 %v1309_v25  ;;  %v1310_v25 = vld [vmem:[%s1697_s4] sm:$0xff]  }
  0x5c   :  { %1196 = vmatprep.subr.bf16.mxu0 %v1486_v38 }
 0x111   :  { %v1174_v28 = vpop.f32.mrb[0].mxu0 }
 0x112   :  { %v139_v29 = vpop.f32.mrb[1].mxu0 }
 0x113   :  { %1328 = vtanh.f32 %v139_v29  ;;  %v1175_v30 = vpop.f32.mrb[2].mxu0 }
 0x114   :  { %1330 = vtanh.f32 %v1175_v30  ;;  %v142_v31 = vpop.f32.mrb[3].mxu0 }
 0x115   :  { %1332 = vtanh.f32 %v142_v31 }
 0x116   :  { %1334 = vtanh.f32 %v1174_v28  ;;  %v1117_v28 = vcombine.high %v768_v27, %v768_v27 }
 0x11d   :  { %v1596_v32 = vpop.eup %1328 }
 0x11e   :  { %v1598_v33 = vpop.eup %1330 }
 0x11f   :  { %v1600_v34 = vpop.eup %1332 }
 0x120   :  { %v1602_v35 = vpop.eup %1334  ;;  %v158_v36 = vpack.c.bf16 %v1600_v34, %v1596_v32 }
 0x121   :  { %v159_v37 = vpack.c.bf16 %v1598_v33, %v1602_v35 }
 0x122   :  { %353 = vmatmul.mubr.bf16.vlgmr.msra.gmra.mrb[0].mxu1 %v158_v36  ;;  %1192 = vmatprep.mubr.bf16.mxu0 %v158_v36 }
 0x123   :  { %1193 = vmatmul.mubr.bf16.vlgmr.msra.gmra.mrb[4].mxu0 %v159_v37  ;;  %362 = vmatprep.mubr.bf16.mxu1 %v1485_v26 }
 0x124   :  { %1198 = vmatprep.mubr.msk.bf16.mxu0 %vm1487_vm1, %v1486_v38 }
 0x12a   :  { %363 = vmatmul.mubr.bf16.gmra.mrb[4].mxu1 %v159_v37 }
 0x12b   :  { %1216 = vmatprep.mubr.msk.bf16.mxu1 %vm1487_vm1, %v1486_v38 }
 0x1f5   :  { %v354_v39 = vpop.f32.mrb[0].mxu1 }
 0x1f6   :  { %v356_v40 = vpop.f32.mrb[1].mxu1  ;;  %v1194_v41 = vpop.f32.mrb[4].mxu0 }
 0x1f7   :  { %v358_v42 = vpop.f32.mrb[2].mxu1  ;;  %v407_v43 = vpop.f32.mrb[5].mxu0 }
 0x1f8   :  { %v422_v44 = vpack.c.bf16 %v358_v42, %v354_v39  ;;  %v360_v45 = vpop.f32.mrb[3].mxu1  ;;  %v1195_v46 = vpop.f32.mrb[6].mxu0  ;;  %v1311_v42 = vld [vmem:[%s1697_s4 + $0x8] sm:$0xff]  }
 0x1f9   :  { %v424_v47 = vpack.c.bf16 %v360_v45, %v356_v40  ;;  %v427_v48 = vpack.c.bf16 %v1195_v46, %v1194_v41  ;;  %v410_v49 = vpop.f32.mrb[7].mxu0 }
 0x1fa   :  { %v426_v50 = vpack.c.bf16 %v410_v49, %v407_v43  ;;  %v1313_v49 = vld [vmem:[%s1697_s4 + $0x18] sm:$0xff]  }
 0x1fb   :  { %1197 = vmatpush3.bf16.xpose.msra.mxu0 %v424_v47  ;;  %1215 = vmatpush3.bf16.msra.mxu1 %v427_v48 }
 0x1fc   :  { %1202 = vmatprep.subr.bf16.mxu0 %v1486_v38  ;;  %1118 = vmatprep.subr.msk.bf16.mxu1 %vm790_vm2, %v1117_v28 }
 0x1fd   :  { %v364_v51 = vpop.f32.mrb[4].mxu1 }
 0x1fe   :  { %v366_v52 = vpop.f32.mrb[5].mxu1 }
 0x1ff   :  { %v368_v53 = vpop.f32.mrb[6].mxu1 }
 0x200   :  { %v423_v54 = vpack.c.bf16 %v368_v53, %v364_v51  ;;  %v370_v55 = vpop.f32.mrb[7].mxu1  ;;  %v1116_v51 = vcombine.low %v768_v27, %v768_v27  ;;  %v1317_v53 = vld [vmem:[%s1697_s4 + $0x28] sm:$0xff]  }
 0x201   :  { %v425_v56 = vpack.c.bf16 %v370_v55, %v366_v52  ;;  %v1319_v55 = vld [vmem:[%s1697_s4 + $0x38] sm:$0xff]  }
 0x202   :  { %1199 = vmatmul.mubr.bf16.vlgmr.msra.gmra.mrb[8].mxu0 %v422_v44  ;;  %v1312_v44 = vld [vmem:[%s1697_s4 + $0x10] sm:$0xff]   ;;  %v792_v52 = vsel %vm790_vm2, %v1116_v51, 0 }
 0x203   :  { %1203 = vmatpush3.bf16.xpose.msra.mxu0 %v425_v56  ;;  %1204 = vmatprep.mubr.msk.bf16.mxu0 %vm1487_vm1, %v1486_v38  ;;  %v1320_v56 = vld [vmem:[#allocation5] sm:$0xff]  }
 0x204   :  { %1208 = vmatprep.subr.bf16.mxu0 %v1486_v38 }
 0x20a   :  { %1205 = vmatmul.mubr.bf16.vlgmr.msra.gmra.mrb[12].mxu0 %v423_v54  ;;  %v1318_v54 = vld [vmem:[%s1697_s4 + $0x30] sm:$0xff]  }
 0x20b   :  { %1209 = vmatpush3.bf16.msra.mxu0 %v426_v50  ;;  %1210 = vmatprep.mubr.msk.bf16.mxu0 %vm1487_vm1, %v1486_v38  ;;  %v1314_v50 = vld [vmem:[%s1697_s4 + $0x20] sm:$0xff]  }
 0x20c   :  { %1220 = vmatprep.subr.bf16.mxu0 %v1310_v25 }
 0x2d5   :  { %v462_v57 = vpop.f32.mrb[8].mxu0 }
 0x2d6   :  { %v1200_v58 = vpop.f32.mrb[9].mxu0  ;;  %v510_v59 = vsel %vm98_vm0, %v462_v57, -inf }
 0x2d7   :  { %511 = vmax.xlane.f32.xlu0 %v510_v59  ;;  %v465_v60 = vpop.f32.mrb[10].mxu0  ;;  %v1322_v58 = vld [vmem:[#allocation5 + $0x10] sm:$0xff]  }
 0x2d8   :  { %v1201_v61 = vpop.f32.mrb[11].mxu0  ;;  %v513_v62 = vsel %vm98_vm0, %v465_v60, -inf }
 0x2db   :  { %514 = vmax.xlane.f32.xlu0 %v513_v62 }
 0x2dd   :  { %v503_v63 = vpop.f32.mrb[12].mxu0 }
 0x2de   :  { %v1206_v0 = vpop.f32.mrb[13].mxu0  ;;  %v516_v1 = vsel %vm98_vm0, %v503_v63, -inf }
 0x2df   :  { %517 = vmax.xlane.f32.xlu1 %v516_v1  ;;  %v506_v2 = vpop.f32.mrb[14].mxu0 }
 0x2e0   :  { %v1207_v3 = vpop.f32.mrb[15].mxu0  ;;  %v519_v4 = vsel %vm98_vm0, %v506_v2, -inf }
 0x2e3   :  { %520 = vmax.xlane.f32.xlu1 %v519_v4 }
 0x364   :  { %v512_v5 = vpop.xlane.xlu0 %511 }
 0x365   :  { %v522_v6 = vsub.f32 %v462_v57, %v512_v5  ;;  %v1321_v57 = vld [vmem:[#allocation5 + $0x8] sm:$0xff]  }
 0x367   :  { %v526_v7 = vmul.f32 1.442695, %v522_v6 }
 0x368   :  { %v515_v8 = vpop.xlane.xlu0 %514 }
 0x369   :  { %1336 = vpow2.f32 %v526_v7  ;;  %v523_v9 = vsub.f32 %v465_v60, %v515_v8 }
 0x36b   :  { %v528_v10 = vmul.f32 1.442695, %v523_v9 }
 0x36c   :  { %v518_v11 = vpop.xlane.xlu1 %517 }
 0x36d   :  { %1338 = vpow2.f32 %v528_v10  ;;  %v524_v12 = vsub.f32 %v503_v63, %v518_v11 }
 0x36f   :  { %v530_v13 = vmul.f32 1.442695, %v524_v12 }
 0x370   :  { %v521_v14 = vpop.xlane.xlu1 %520 }
 0x371   :  { %1340 = vpow2.f32 %v530_v13  ;;  %v525_v15 = vsub.f32 %v506_v2, %v521_v14  ;;  %v1325_v13 = vld [vmem:[#allocation5 + $0x28] sm:$0xff]   ;;  %v1326_v14 = vld [vmem:[#allocation5 + $0x30] sm:$0xff]  }
 0x373   :  { %v1337_v16 = vpop.eup %1336  ;;  %v532_v17 = vmul.f32 1.442695, %v525_v15 }
 0x374   :  { %v534_v18 = vsel %vm98_vm0, %v1337_v16, 0.0 }
 0x375   :  { %1342 = vpow2.f32 %v532_v17  ;;  %535 = vadd.xlane.f32.xlu0 %v534_v18  ;;  %v769_v17 = vld [vmem:[%s1699_s6] sm:$0x3]  ;;  %s1489_s6 = smov [#allocation9]  }
 0x376   :  { %s1060_s12 = sshll.u32 %s1489_s6, 4  ;;  %s1061_s12 = int_to_ptr.vmem [resolvable:$true] %s1060_s12 }
 0x377   :  { %v1339_v19 = vpop.eup %1338  ;;  %s1426_s13 = scalar_lea.vmem %s1061_s12, 512  ;;  %p1431_p11 = scmp.lt.s32.totalorder %s1061_s12, %s1061_s12 }
 0x378   :  { %v537_v20 = vsel %vm98_vm0, %v1339_v19, 0.0  ;;  %p1427_p10 = scmp.ne.s32.totalorder %s1061_s12, %s1426_s13  ;;  %p1432_p12 = scmp.lt.s32.totalorder %s1426_s13, %s1426_s13 }
 0x379   :  { %538 = vadd.xlane.f32.xlu1 %v537_v20 }
 0x37a   :  { %p1433_p13 = por %p1432_p12, %p1431_p11 }
 0x37b   :  { %v1341_v21 = vpop.eup %1340 }
 0x37c   :  { %v540_v22 = vsel %vm98_vm0, %v1341_v21, 0.0  ;;  %p1434_p0 = pnand %p1433_p13, %p1427_p10 }
 0x37d   :  { %541 = vadd.xlane.f32.xlu0 %v540_v22 }
 0x37f   :  { %v1343_v23 = vpop.eup %1342 }
 0x380   :  { %v543_v24 = vsel %vm98_vm0, %v1343_v23, 0.0 }
 0x381   :  { %544 = vadd.xlane.f32.xlu1 %v543_v24 }
 0x402   :  { %v536_v29 = vpop.xlane.xlu0 %535 }
 0x403   :  { %1344 = vrcp.f32 %v536_v29 }
 0x406   :  { %v539_v30 = vpop.xlane.xlu1 %538 }
 0x407   :  { %1346 = vrcp.f32 %v539_v30 }
 0x40a   :  { %v542_v31 = vpop.xlane.xlu0 %541 }
 0x40b   :  { %1348 = vrcp.f32 %v542_v31 }
 0x40d   :  { %v1345_v37 = vpop.eup %1344 }
 0x40e   :  { %v545_v36 = vpop.xlane.xlu1 %544  ;;  %v550_v39 = vmul.f32 %v1345_v37, %v1337_v16 }
 0x40f   :  { %1350 = vrcp.f32 %v545_v36 }
 0x411   :  { %v1347_v38 = vpop.eup %1346 }
 0x412   :  { %v551_v40 = vmul.f32 %v1347_v38, %v1339_v19  ;;  %v1488_v19 = vmov 1966171168  }
 0x413   :  { %v841_v20 = vunpack.c.l.s4 %v1488_v19 }
 0x414   :  { %v554_v41 = vpack.c.bf16 %v551_v40, %v550_v39 }
 0x415   :  { %v1349_v43 = vpop.eup %1348 }
 0x416   :  { %1211 = vmatmul.mubr.msk.bf16.vlgmr.msra.gmra.mrb[16].mxu0 %vm98_vm0, %v554_v41  ;;  %v552_v46 = vmul.f32 %v1349_v43, %v1341_v21 }
 0x417   :  { %1221 = vmatpush3.bf16.msra.mxu0 %v1310_v25 }
 0x418   :  { %1222 = vmatprep.subr.bf16.mxu0 %v1311_v42 }
 0x419   :  { %v1351_v45 = vpop.eup %1350 }
 0x41a   :  { %v553_v47 = vmul.f32 %v1351_v45, %v1343_v23  ;;  %v842_v23 = vunpack.c.0.s8 %v841_v20 }
 0x41b   :  { %1223 = vmatpush3.bf16.msra.mxu0 %v1311_v42 }
 0x41c   :  { %v555_v48 = vpack.c.bf16 %v553_v47, %v552_v46  ;;  %1224 = vmatprep.subr.bf16.mxu0 %v1312_v44 }
 0x41e   :  { %1217 = vmatmul.mubr.msk.bf16.vlgmr.msra.gmra.mrb[8].mxu1 %vm98_vm0, %v555_v48 }
 0x41f   :  { %1225 = vmatpush3.bf16.msra.mxu0 %v1312_v44  ;;  %829 = vmatprep.mubr.bf16.mxu1 %v1485_v26  ;;  %v767_v26 = vld [vmem:[%s1694_s1] sm:$0x1] }
 0x420   :  { %1226 = vmatprep.subr.bf16.mxu0 %v1313_v49  ;;  %798 = vmatpush1.bf16.msra.mxu1 %v792_v52 }
 0x421   :  { %1240 = vmatprep.subr.bf16.mxu1 %v1320_v56 }
 0x423   :  { %1227 = vmatpush3.bf16.msra.mxu0 %v1313_v49 }
 0x424   :  { %1228 = vmatprep.subr.bf16.mxu0 %v1314_v50 }
 0x426   :  { %1119 = vmatmul.mubr.msk.bf16.vlgmr.msra.gmra.mrb[12].mxu1 %vm786_vm3, %v767_v26 }
 0x427   :  { %1229 = vmatpush3.bf16.msra.mxu0 %v1314_v50  ;;  %1241 = vmatpush3.bf16.msra.mxu1 %v1320_v56 }
 0x428   :  { %1230 = vmatprep.subr.bf16.mxu0 %v1317_v53  ;;  %1242 = vmatprep.subr.bf16.mxu1 %v1321_v57 }
 0x42b   :  { %1231 = vmatpush3.bf16.msra.mxu0 %v1317_v53  ;;  %1243 = vmatpush3.bf16.msra.mxu1 %v1321_v57 }
 0x42c   :  { %1232 = vmatprep.subr.bf16.mxu0 %v1318_v54  ;;  %1244 = vmatprep.subr.bf16.mxu1 %v1322_v58 }
 0x42f   :  { %1233 = vmatpush3.bf16.msra.mxu0 %v1318_v54  ;;  %1245 = vmatpush3.bf16.msra.mxu1 %v1322_v58 }
 0x430   :  { %1234 = vmatprep.subr.bf16.mxu0 %v1319_v55 }
 0x433   :  { %1235 = vmatpush3.bf16.msra.mxu0 %v1319_v55 }
 0x4e9   :  { %v593_v59 = vpop.f32.mrb[16].mxu0 }
 0x4ea   :  { %v1212_v60 = vpop.f32.mrb[17].mxu0  ;;  %v644_v62 = vadd.f32 %v1596_v32, %v593_v59  ;;  %v1323_v32 = vld [vmem:[#allocation5 + $0x18] sm:$0xff]  }
 0x4eb   :  { %v596_v61 = vpop.f32.mrb[18].mxu0  ;;  %1246 = vmatprep.subr.bf16.mxu1 %v1323_v32 }
 0x4ec   :  { %v645_v63 = vadd.f32 %v1600_v34, %v596_v61  ;;  %v1213_v0 = vpop.f32.mrb[19].mxu0  ;;  %1247 = vmatpush3.bf16.msra.mxu1 %v1323_v32  ;;  %v1324_v34 = vld [vmem:[#allocation5 + $0x20] sm:$0xff]  }
 0x4ed   :  { %1248 = vmatprep.subr.bf16.mxu1 %v1324_v34 }
 0x4ee   :  { %v648_v1 = vpack.c.bf16 %v645_v63, %v644_v62 }
 0x4f0   :  { %1236 = vmatprep.mubr.bf16.mxu0 %v648_v1  ;;  %1249 = vmatpush3.bf16.msra.mxu1 %v1324_v34 }
 0x4f1   :  { %v637_v2 = vpop.f32.mrb[8].mxu1  ;;  %1250 = vmatprep.subr.bf16.mxu1 %v1325_v13 }
 0x4f2   :  { %v1218_v3 = vpop.f32.mrb[9].mxu1  ;;  %v646_v5 = vadd.f32 %v1602_v35, %v637_v2  ;;  %v1327_v35 = vld [vmem:[#allocation5 + $0x38] sm:$0xff]  }
 0x4f3   :  { %v640_v4 = vpop.f32.mrb[10].mxu1 }
 0x4f4   :  { %v647_v6 = vadd.f32 %v1598_v33, %v640_v4  ;;  %v1219_v7 = vpop.f32.mrb[11].mxu1  ;;  %1251 = vmatpush3.bf16.msra.mxu1 %v1325_v13  ;;  %v771_v33 = vlaneseq }
 0x4f5   :  { %1252 = vmatprep.subr.bf16.mxu1 %v1326_v14 }
 0x4f6   :  { %v649_v8 = vpack.c.bf16 %v647_v6, %v646_v5  ;;  %v772_v15 = vshrl.u32 %v771_v33, 7 }
 0x4f8   :  { %1237 = vmatmul.mubr.bf16.vlgmr.msra.gmra.mrb[20].mxu0 %v649_v8  ;;  %1253 = vmatpush3.bf16.msra.mxu1 %v1326_v14  ;;  %v773_v16 = vsub.s32 0, %v772_v15  ;;  %v777_v21 = vsub.s32 1, %v772_v15  ;;  %v845_v27 = vsub.s32 %v842_v23, %v772_v15 }
 0x4f9   :  { %v831_v9 = vpop.f32.mrb[12].mxu1  ;;  %1254 = vmatprep.subr.bf16.mxu1 %v1327_v35 }
 0x4fa   :  { %v833_v10 = vpop.f32.mrb[13].mxu1  ;;  %v774_v18 = vrot.slane %v769_v17, %v773_v16  ;;  %v778_v24 = vrot.slane %v769_v17, %v777_v21 }
 0x4fb   :  { %v835_v11 = vpop.f32.mrb[14].mxu1 }
 0x4fc   :  { %v836_v12 = vpop.f32.mrb[15].mxu1  ;;  %1255 = vmatpush3.bf16.msra.mxu1 %v1327_v35  ;;  %v832_v22 = vadd.f32 %v831_v9, %v774_v18  ;;  %v834_v28 = vadd.f32 %v833_v10, %v778_v24 }
 0x4fe   :  { %v838_v25 = vadd.f32 1.0, %v832_v22  ;;  %v883_v30 = vrot.slane %v834_v28, %v845_v27 }
 0x500   :  { %v846_v29 = vrot.slane %v838_v25, %v845_v27  ;;  %v884_v36 = vcombine.high %v883_v30, %v883_v30  ;;  %v891_v41 = vrot.slane %v883_v30, %v845_v27 }
 0x502   :  { %v847_v31 = vcombine.high %v846_v29, %v846_v29  ;;  %v854_v38 = vrot.slane %v846_v29, %v845_v27  ;;  %v898_v39 = vrot.slane %v884_v36, %v845_v27  ;;  %v902_v48 = vrot.slane %v891_v41, %v773_v16 }
 0x504   :  { %v861_v37 = vrot.slane %v847_v31, %v845_v27  ;;  %v865_v42 = vrot.slane %v854_v38, %v773_v16  ;;  %v906_v43 = vrot.slane %v898_v39, %v773_v16 }
 0x506   :  { %v869_v40 = vrot.slane %v861_v37, %v773_v16 }
 0x5cb   :  { %v1238_v44 = vpop.f32.mrb[20].mxu0 }
 0x5cc   :  { %765 = vst [vmem:[#allocation9 + $0x10] sm:$0xff] %v1238_v44  ;;  %v874_v45 = vmul.f32 %v1238_v44, %v869_v40  ;;  %v748_v46 = vpop.f32.mrb[21].mxu0 }
 0x5cd   :  { %763 = vst [vmem:[#allocation9] sm:$0xff] %v748_v46  ;;  %v872_v47 = vmul.f32 %v865_v42, %v748_v46  ;;  %v1239_v49 = vpop.f32.mrb[22].mxu0 }
 0x5ce   :  { %v911_v50 = vadd.f32 %v906_v43, %v874_v45  ;;  %766 = vst [vmem:[#allocation9 + $0x18] sm:$0xff] %v1239_v49  ;;  %v875_v51 = vmul.f32 %v1239_v49, %v869_v40  ;;  %v751_v52 = vpop.f32.mrb[23].mxu0 }
 0x5cf   :  { %v909_v53 = vadd.f32 %v902_v48, %v872_v47  ;;  %764 = vst [vmem:[#allocation9 + $0x8] sm:$0xff] %v751_v52  ;;  %v873_v26 = vmul.f32 %v865_v42, %v751_v52 }
 0x5d0   :  { %1352 = vtanh.f32 %v911_v50  ;;  %v912_v54 = vadd.f32 %v906_v43, %v875_v51 }
 0x5d1   :  { %1354 = vtanh.f32 %v909_v53  ;;  %v910_v55 = vadd.f32 %v902_v48, %v873_v26 }
 0x5d2   :  { %1356 = vtanh.f32 %v912_v54 }
 0x5d3   :  { %1358 = vtanh.f32 %v910_v55 }
 0x5da   :  { %v1353_v56 = vpop.eup %1352 }
 0x5db   :  { %v1355_v57 = vpop.eup %1354 }
 0x5dc   :  { %v1357_v58 = vpop.eup %1356 }
 0x5dd   :  { %v1359_v59 = vpop.eup %1358  ;;  %v918_v60 = vpack.c.bf16 %v1357_v58, %v1353_v56 }
 0x5de   :  { %v917_v61 = vpack.c.bf16 %v1359_v59, %v1355_v57 }
 0x5e0   :  { %1256 = vmatprep.mubr.bf16.mxu1 %v917_v61 }
 0x5e1   :  { %1257 = vmatmul.mubr.bf16.vlgmr.msra.gmra.mrb[16].mxu1 %v918_v60 }
 0x5e2   :  { %1437 = shalt.err (!%p1434_p0)
}
 0x5e3   :  { %s1438_s17 = scalar_lea.hbm %s1703_s10, 512 }
 0x5e4   :  { %p1439_p1 = scmp.ne.s32.totalorder %s1703_s10, %s1438_s17  ;;  %p1442_p2 = scmp.lt.u32.totalorder %s1438_s17, %s1703_s10 }
 0x5e6   :  { %p1444_p3 = pnand %p1442_p2, %p1439_p1 }
 0x5e8   :  { %1447 = shalt.err (!%p1444_p3)
}
 0x5e9   :  { %s1490_s14 = smov 128   ;;  %s1491_s18 = smov 8   ;;  %v1120_v62 = vld [vmem:[#allocation7] ss:$0 sm:$0xff] }
 0x5ea   :  { %1066 = dma.vmem_to_hbm [thread:$0]  %s1061_s12, 512, %s1703_s10, [#allocation10], %s1490_s14, %s1490_s14, %s1491_s18  }
 0x5eb   :  { %s1492_s20 = smov [#allocation8]  }
 0x5ec   :  { %s1048_s21 = sshll.u32 %s1492_s20, 4  ;;  %s1049_s21 = int_to_ptr.vmem [resolvable:$true] %s1048_s21 }
 0x5ed   :  { %s1448_s22 = scalar_lea.vmem %s1049_s21, 512  ;;  %p1453_p5 = scmp.lt.s32.totalorder %s1049_s21, %s1049_s21 }
 0x5ee   :  { %p1449_p4 = scmp.ne.s32.totalorder %s1049_s21, %s1448_s22  ;;  %p1454_p6 = scmp.lt.s32.totalorder %s1448_s22, %s1448_s22 }
 0x5f0   :  { %p1455_p7 = por %p1454_p6, %p1453_p5 }
 0x5f2   :  { %p1456_p8 = pnand %p1455_p7, %p1449_p4 }
 0x6b4   :  { %v1258_v63 = vpop.f32.mrb[16].mxu1 }
 0x6b5   :  { %v1033_v0 = vadd.f32 %v1258_v63, %v1120_v62  ;;  %v1024_v1 = vpop.f32.mrb[17].mxu1 }
 0x6b6   :  { %v1025_v2 = vadd.f32 %v1120_v62, %v1024_v1  ;;  %v1259_v3 = vpop.f32.mrb[18].mxu1 }
 0x6b7   :  { %1041 = vst [vmem:[#allocation8 + $0x10] sm:$0xff] %v1033_v0  ;;  %v1036_v4 = vadd.f32 %v1259_v3, %v1120_v62  ;;  %v1027_v5 = vpop.f32.mrb[19].mxu1 }
 0x6b8   :  { %1039 = vst [vmem:[#allocation8] sm:$0xff] %v1025_v2  ;;  %v1028_v6 = vadd.f32 %v1120_v62, %v1027_v5 }
 0x6b9   :  { %1042 = vst [vmem:[#allocation8 + $0x18] sm:$0xff] %v1036_v4 }
 0x6ba   :  { %1040 = vst [vmem:[#allocation8 + $0x8] sm:$0xff] %v1028_v6 }
 0x6bb   :  { %1459 = shalt.err (!%p1456_p8)
}
 0x6bc   :  { %s1460_s24 = scalar_lea.hbm %s1702_s9, 512 }
 0x6bd   :  { %p1461_p9 = scmp.ne.s32.totalorder %s1702_s9, %s1460_s24  ;;  %p1464_p10 = scmp.lt.u32.totalorder %s1460_s24, %s1702_s9 }
 0x6bf   :  { %p1466_p11 = pnand %p1464_p10, %p1461_p9 }
 0x6c1   :  { %1469 = shalt.err (!%p1466_p11)
}
 0x6c2   :  { %1054 = dma.vmem_to_hbm [thread:$0]  %s1049_s21, 512, %s1702_s9, [#allocation4], %s1490_s14, %s1490_s14, %s1491_s18  }
 0x6c3   :  { %1474 = dma.done.wait [#allocation4], 512  }
 0x6c4   :  { %1475 = vsyncadd [#allocation4], 4294966784 }
 0x6c5   :  { %1476 = dma.done.wait [#allocation10], 512  }
 0x6c6   :  { %1477 = vsyncadd [#allocation10], 4294966784 }
 0x6c7   :  { %1073 = vsyncpa [#allocation3], 1 }
 0x6c8   :  { %1074 = vsyncpa [#allocation6], 1 }
 0x6c9   :  { %1075 = vsyncpa [#allocation4], 1 }
 0x6ca   :  { %1076 = vsyncpa [#allocation10], 1 }

</bundles_post_ra>
